<compile_context>
chip_gen: v6e
topology: v6e:2x2x1
jax: 0.10.0
libtpu: 0.0.40
codegen_flags: <defaults>
</compile_context>

<pallas_src>
import functools

import jax
import jax.numpy as jnp
import numpy as np
from jax.experimental import pallas as pl
from jax.experimental.pallas import tpu as pltpu


DEFAULT_WEIGHTS = (0.0448, 0.2856, 0.3001, 0.2363, 0.1333)


# --------------------------- host-side parameter setup ------------------------

def _gauss_1d(win_size: int, sigma: float = 1.5) -> np.ndarray:
    x = np.arange(win_size, dtype=np.float64) - win_size // 2
    g = np.exp(-(x ** 2) / (2.0 * sigma ** 2))
    return (g / g.sum()).astype(np.float32)


def _conv_matrices(h: int, w: int, ws: int):
    """Separable 'VALID' Gaussian conv as two matmuls: out = A @ img @ Bm."""
    k = _gauss_1d(ws)
    hp, wp = h - ws + 1, w - ws + 1
    A = np.zeros((hp, h), np.float32)
    for i in range(hp):
        A[i, i:i + ws] = k
    Bm = np.zeros((w, wp), np.float32)
    for j in range(wp):
        Bm[j:j + ws, j] = k
    return A, Bm


def _pool_matrices(h: int, w: int):
    """2x2 stride-2 average pool (ceil_mode) as pooled = Ph @ img @ Pw."""
    hn, wn = -(-h // 2), -(-w // 2)
    Ph = np.zeros((hn, h), np.float32)
    for i in range(hn):
        cols = [2 * i] + ([2 * i + 1] if 2 * i + 1 < h else [])
        Ph[i, cols] = 1.0 / len(cols)
    Pw = np.zeros((w, wn), np.float32)
    for j in range(wn):
        rows = [2 * j] + ([2 * j + 1] if 2 * j + 1 < w else [])
        Pw[rows, j] = 1.0 / len(rows)
    # TODO(synk): confirm PyTorch avg_pool2d ceil_mode divisor parity for odd H/W edges.
    return Ph, Pw


def _scale_plan(H: int, W: int, win_size: int, weights):
    """Static MS-SSIM pyramid plan mirroring torch ms_ssim()'s loop/break logic."""
    ws = min(H, W, win_size)
    m = len(weights)
    dims = [(H, W)]
    w_used = [float(x) for x in weights]
    h, w = H, W
    for i in range(1, m):
        h, w = -(-h // 2), -(-w // 2)
        if h < ws or w < ws:
            tot = float(sum(weights[:i]))
            w_used = [float(x) / tot for x in weights[:i]]
            break
        dims.append((h, w))
    return ws, dims, w_used, m


# ------------------------------------ kernel ----------------------------------

def _ms_ssim_kernel(*refs, num_classes: int, plan):
    pred_ref, tgt_ref = refs[0], refs[1]
    out_ref = refs[-1]
    mats = refs[2:-1]
    C = num_classes

    # Channel softmax — computed once for all classes.
    logits = pred_ref[0]                                      # (C, H, W)
    mx = jnp.max(logits, axis=0)                              # (H, W)
    e = jnp.exp(logits - mx[None, :, :])                      # (C, H, W)
    probs = e / jnp.sum(e, axis=0)[None, :, :]                # (C, H, W)

    # One-hot target — built once (full-shape iota; no tiny-iota corner cases).
    labels = tgt_ref[0]                                       # (H, W) int32
    cls = jax.lax.broadcasted_iota(jnp.int32, logits.shape, 0)
    onehot = (labels[None, :, :] == cls).astype(jnp.float32)  # (C, H, W)

    H0, W0 = plan[0][0], plan[0][1]
    img1 = probs.reshape(C * H0, W0)      # class planes stacked along sublanes
    img2 = onehot.reshape(C * H0, W0)

    c1 = (0.01 * 1.0) ** 2
    c2 = (0.03 * 1.0) ** 2

    results = []
    mi = 0
    for (h, w, hp, wp, use_ss, pooled) in plan:
        if pooled:
            # 2x2 ceil-mode average pool as two matmuls (block-diag row pooling).
            ph_blk = mats[mi][...]                            # (C*h, C*h_prev)
            pw = mats[mi + 1][...]                            # (w_prev, w)
            mi += 2
            img1 = jnp.dot(jnp.dot(ph_blk, img1, preferred_element_type=jnp.float32),
                           pw, preferred_element_type=jnp.float32)
            img2 = jnp.dot(jnp.dot(ph_blk, img2, preferred_element_type=jnp.float32),
                           pw, preferred_element_type=jnp.float32)

        a_blk = mats[mi][...]                                 # (5*C*hp, 5*C*h)
        bm = mats[mi + 1][...]                                # (w, wp)
        gmean = mats[mi + 2][...]                             # (C, C*hp) incl. 1/(hp*wp)
        mi += 3

        # All 5 statistics x C classes stacked along sublanes -> TWO wide matmuls.
        stats = jnp.concatenate(
            [img1, img2, img1 * img1, img2 * img2, img1 * img2], axis=0)  # (5*C*h, w)
        y = jnp.dot(stats, bm, preferred_element_type=jnp.float32)          # (5*C*h, wp)
        z = jnp.dot(a_blk, y, preferred_element_type=jnp.float32)           # (5*C*hp, wp)

        n = C * hp
        mu1, mu2 = z[0:n], z[n:2 * n]
        s11, s22, s12 = z[2 * n:3 * n], z[3 * n:4 * n], z[4 * n:5 * n]
        mean12 = mu1 * mu2
        mean1 = mu1 * mu1
        mean2 = mu2 * mu2
        var1 = s11 - mean1
        var2 = s22 - mean2
        covar = s12 - mean12
        cs_map = (2.0 * covar + c2) / (var1 + var2 + c2)
        if use_ss:                       # only the last full pyramid level uses ss
            sel = (2.0 * mean12 + c1) / (mean1 + mean2 + c1) * cs_map
        else:
            sel = cs_map                                       # (C*hp, wp)

        # Per-class spatial mean: class-grouping matmul (scale baked in) + lane sum.
        grouped = jnp.dot(gmean, sel, preferred_element_type=jnp.float32)   # (C, wp)
        per_class = jnp.sum(grouped, axis=-1, keepdims=True)                # (C, 1)
        results.append(per_class)

    vals = results[0] if len(results) == 1 else jnp.concatenate(results, axis=1)
    out_ref[...] = vals[None, :, :]       # one lane-dense write per batch element


# ----------------------------------- wrapper ----------------------------------

def ms_ssim_loss(pred, target, win_size: int = 11,
                 weights=DEFAULT_WEIGHTS, nonnegative: bool = True):
    """Equivalent of MS_SSIMLoss(win_size, weights, nonnegative, process_input=True)."""
    B, C, H, W = pred.shape
    ws, dims, w_used, m_total = _scale_plan(H, W, win_size, weights)
    n_scales = len(dims)

    plan = []
    mats = []
    prev_h = prev_w = None
    for s, (h, w) in enumerate(dims):
        pooled = s > 0
        if pooled:
            Ph, Pw = _pool_matrices(prev_h, prev_w)
            mats.append(np.kron(np.eye(C, dtype=np.float32), Ph))   # (C*h, C*h_prev)
            mats.append(Pw)                                         # (w_prev, w)
        A, Bm = _conv_matrices(h, w, ws)
        hp, wp = h - ws + 1, w - ws + 1
        # TODO(synk): for large images the kron'd left matrices grow O((5*C*H)^2);
        # switch to H'-band tiling with a (ws-1) halo and set vmem_limit_bytes
        # (matters most on v7x's 64 MiB VMEM).
        mats.append(np.kron(np.eye(5 * C, dtype=np.float32), A))    # (5*C*hp, 5*C*h)
        mats.append(Bm)                                             # (w, wp)
        mats.append(np.kron(np.eye(C, dtype=np.float32),
                            np.full((1, hp), 1.0 / float(hp * wp), np.float32)))  # (C, C*hp)
        plan.append((h, w, hp, wp, s == m_total - 1, pooled))
        prev_h, prev_w = h, w

    in_specs = [
        pl.BlockSpec((1, C, H, W), lambda b: (b, 0, 0, 0)),   # logits (all channels)
        pl.BlockSpec((1, H, W), lambda b: (b, 0, 0)),         # target labels
    ]
    in_specs += [pl.BlockSpec(mat.shape, lambda b: (0, 0)) for mat in mats]

    kernel = functools.partial(_ms_ssim_kernel, num_classes=C, plan=tuple(plan))

    out = pl.pallas_call(
        kernel,
        out_shape=jax.ShapeDtypeStruct((B, C, n_scales), jnp.float32),
        grid_spec=pltpu.PrefetchScalarGridSpec(
            num_scalar_prefetch=0,
            grid=(B,),
            in_specs=in_specs,
            out_specs=pl.BlockSpec((1, C, n_scales), lambda b: (b, 0, 0)),
        ),
        compiler_params=pltpu.CompilerParams(
            dimension_semantics=("parallel",)),
    )(pred.astype(jnp.float32), target.astype(jnp.int32),
      *[jnp.asarray(mat) for mat in mats])

    vals = out                                               # (B, C, n_scales)
    if nonnegative:
        vals = jnp.maximum(vals, 0.0)
    wvec = jnp.asarray(w_used, jnp.float32)                  # (n_scales,)
    msss = jnp.prod(vals ** wvec, axis=-1)                   # (B, C)
    # torch: loss = mean over classes of (1 - batch-mean of msss)
    return jnp.mean(1.0 - jnp.mean(msss, axis=0))


# ------------------------------ pure-JAX reference -----------------------------

def ms_ssim_loss_reference(pred, target, win_size: int = 11,
                           weights=DEFAULT_WEIGHTS, nonnegative: bool = True):
    B, C, H, W = pred.shape
    ws = min(H, W, win_size)
    m = len(weights)
    k = jnp.asarray(_gauss_1d(ws))
    k2 = jnp.outer(k, k)[None, None, :, :]
    probs = jax.nn.softmax(pred.astype(jnp.float32), axis=1)
    onehot = jax.nn.one_hot(target, C, axis=1, dtype=jnp.float32)

    def conv(x):
        return jax.lax.conv_general_dilated(
            x, k2, window_strides=(1, 1), padding="VALID",
            dimension_numbers=("NCHW", "OIHW", "NCHW"),
            precision=jax.lax.Precision.HIGHEST)

    def pool(x):
        h, w = x.shape[-2], x.shape[-1]
        Ph, Pw = _pool_matrices(h, w)
        return jnp.einsum("ph,bchw,wq->bcpq", jnp.asarray(Ph), x, jnp.asarray(Pw),
                          precision=jax.lax.Precision.HIGHEST)

    c1 = (0.01 * 1.0) ** 2
    c2 = (0.03 * 1.0) ** 2
    loss = 0.0
    for ci in range(C):
        x = probs[:, ci:ci + 1]
        y = onehot[:, ci:ci + 1]
        css = []
        w_used = jnp.asarray(weights, jnp.float32)
        for s in range(m):
            if s > 0:
                x = pool(x)
                y = pool(y)
                h, w = x.shape[-2], x.shape[-1]
                if h < ws or w < ws:
                    w_used = jnp.asarray(weights[:s], jnp.float32)
                    w_used = w_used / jnp.sum(w_used)
                    break
            mu1, mu2 = conv(x), conv(y)
            mean12 = mu1 * mu2
            mean1 = mu1 ** 2
            mean2 = mu2 ** 2
            var1 = conv(x * x) - mean1
            var2 = conv(y * y) - mean2
            covar = conv(x * y) - mean12
            cs = (2.0 * covar + c2) / (var1 + var2 + c2)
            ss = (2.0 * mean12 + c1) / (mean1 + mean2 + c1) * cs
            ssm = ss.reshape(B, 1, -1).mean(axis=-1)
            csm = cs.reshape(B, 1, -1).mean(axis=-1)
            if nonnegative:
                ssm = jnp.maximum(ssm, 0.0)
                csm = jnp.maximum(csm, 0.0)
            css.append(csm if s + 1 < m else ssm)
        stacked = jnp.stack(css, axis=-1)                            # (B, 1, n_used)
        msss = jnp.prod(stacked ** w_used, axis=-1).mean(axis=-1)    # (B,)
        loss = loss + (1.0 - msss.mean())
    return loss / C


# ------------------------------------- main ------------------------------------

if __name__ == "__main__":
    key = jax.random.PRNGKey(0)
    k1, k2 = jax.random.split(key)
    B, C, H, W = 2, 4, 16, 16
    pred = jax.random.normal(k1, (B, C, H, W), dtype=jnp.float32)
    target = jax.random.randint(k2, (B, H, W), 0, C, dtype=jnp.int32)

    loss = jax.block_until_ready(ms_ssim_loss(pred, target))
    ref = jax.block_until_ready(ms_ssim_loss_reference(pred, target))
    np.testing.assert_allclose(np.asarray(loss), np.asarray(ref), rtol=1e-3, atol=1e-4)
    print("KERNEL_OK")
</pallas_src>

<mosaic_0001>
module attributes {stable_mosaic.version = 11 : i64} {
  func.func @_ms_ssim_kernel(%arg0: i32, %arg1: memref<1x4x16x16xf32, #tpu.memory_space<vmem>>, %arg2: memref<1x16x16xi32, #tpu.memory_space<vmem>>, %arg3: memref<120x320xf32, #tpu.memory_space<vmem>>, %arg4: memref<16x6xf32, #tpu.memory_space<vmem>>, %arg5: memref<4x24xf32, #tpu.memory_space<vmem>>, %arg6: memref<1x4x1xf32, #tpu.memory_space<vmem>>) attributes {dimension_semantics = [#tpu.dimension_semantics<parallel>], iteration_bounds = array<i64: 2>, scalar_prefetch = 0 : i64, scratch_operands = 0 : i64, tpu.core_type = #tpu.core_type<tc>, window_params = [{transform_indices = @transform_0, window_bounds = array<i64: 1, 4, 16, 16>}, {transform_indices = @transform_1, window_bounds = array<i64: 1, 16, 16>}, {pipeline_mode = #tpu.pipeline_mode<synchronous>, transform_indices = @transform_2, window_bounds = array<i64: 120, 320>}, {pipeline_mode = #tpu.pipeline_mode<synchronous>, transform_indices = @transform_3, window_bounds = array<i64: 16, 6>}, {pipeline_mode = #tpu.pipeline_mode<synchronous>, transform_indices = @transform_4, window_bounds = array<i64: 4, 24>}, {transform_indices = @transform_5, window_bounds = array<i64: 1, 4, 1>}]} {
    %c0 = arith.constant 0 : index
    %c0_0 = arith.constant 0 : index
    %c0_1 = arith.constant 0 : index
    %c0_2 = arith.constant 0 : index
    %0 = vector.load %arg1[%c0, %c0_0, %c0_1, %c0_2] : memref<1x4x16x16xf32, #tpu.memory_space<vmem>>, vector<1x4x16x16xf32>
    %1 = vector.shape_cast %0 : vector<1x4x16x16xf32> to vector<4x16x16xf32>
    %cst = arith.constant dense<0xFF800000> : vector<16x16xf32>
    %2 = vector.multi_reduction <maximumf>, %1, %cst [0] : vector<4x16x16xf32> to vector<16x16xf32>
    %3 = vector.shape_cast %2 : vector<16x16xf32> to vector<1x16x16xf32>
    %4 = vector.broadcast %3 : vector<1x16x16xf32> to vector<4x16x16xf32>
    %5 = arith.subf %1, %4 : vector<4x16x16xf32>
    %6 = math.exp %5 : vector<4x16x16xf32>
    %cst_3 = arith.constant dense<0.000000e+00> : vector<16x16xf32>
    %7 = vector.multi_reduction <add>, %6, %cst_3 [0] : vector<4x16x16xf32> to vector<16x16xf32>
    %8 = vector.shape_cast %7 : vector<16x16xf32> to vector<1x16x16xf32>
    %9 = vector.broadcast %8 : vector<1x16x16xf32> to vector<4x16x16xf32>
    %10 = arith.divf %6, %9 : vector<4x16x16xf32>
    %c0_4 = arith.constant 0 : index
    %c0_5 = arith.constant 0 : index
    %c0_6 = arith.constant 0 : index
    %11 = vector.load %arg2[%c0_4, %c0_5, %c0_6] : memref<1x16x16xi32, #tpu.memory_space<vmem>>, vector<1x16x16xi32>
    %12 = vector.shape_cast %11 : vector<1x16x16xi32> to vector<16x16xi32>
    %13 = tpu.iota {dimensions = array<i32: 0>} : vector<4x16x16xi32>
    %14 = vector.shape_cast %12 : vector<16x16xi32> to vector<1x16x16xi32>
    %15 = vector.broadcast %14 : vector<1x16x16xi32> to vector<4x16x16xi32>
    %16 = arith.cmpi eq, %15, %13 : vector<4x16x16xi32>
    %17 = arith.extui %16 : vector<4x16x16xi1> to vector<4x16x16xi32>
    %18 = arith.sitofp %17 : vector<4x16x16xi32> to vector<4x16x16xf32>
    %19 = vector.shape_cast %10 : vector<4x16x16xf32> to vector<64x16xf32>
    %20 = vector.shape_cast %18 : vector<4x16x16xf32> to vector<64x16xf32>
    %c0_7 = arith.constant 0 : index
    %c0_8 = arith.constant 0 : index
    %21 = vector.load %arg3[%c0_7, %c0_8] : memref<120x320xf32, #tpu.memory_space<vmem>>, vector<120x320xf32>
    %c0_9 = arith.constant 0 : index
    %c0_10 = arith.constant 0 : index
    %22 = vector.load %arg4[%c0_9, %c0_10] : memref<16x6xf32, #tpu.memory_space<vmem>>, vector<16x6xf32>
    %c0_11 = arith.constant 0 : index
    %c0_12 = arith.constant 0 : index
    %23 = vector.load %arg5[%c0_11, %c0_12] : memref<4x24xf32, #tpu.memory_space<vmem>>, vector<4x24xf32>
    %24 = arith.mulf %19, %19 : vector<64x16xf32>
    %25 = arith.mulf %20, %20 : vector<64x16xf32>
    %26 = arith.mulf %19, %20 : vector<64x16xf32>
    %27 = tpu.concatenate %19, %20, %24, %25, %26 in 0 : vector<64x16xf32>, vector<64x16xf32>, vector<64x16xf32>, vector<64x16xf32>, vector<64x16xf32> -> vector<320x16xf32>
    %cst_13 = arith.constant dense<0.000000e+00> : vector<320x6xf32>
    %28 = tpu.matmul %27, %22, %cst_13 {dimension_numbers = #tpu.dot_dimension_numbers<[1], [0], [0], [1], [0, 0, 1, 1], [], []>} : vector<320x16xf32>, vector<16x6xf32>, vector<320x6xf32> -> vector<320x6xf32>
    %cst_14 = arith.constant dense<0.000000e+00> : vector<120x6xf32>
    %29 = tpu.matmul %21, %28, %cst_14 {dimension_numbers = #tpu.dot_dimension_numbers<[1], [0], [0], [1], [0, 0, 1, 1], [], []>} : vector<120x320xf32>, vector<320x6xf32>, vector<120x6xf32> -> vector<120x6xf32>
    %30 = vector.extract_strided_slice %29 {offsets = [0, 0], sizes = [24, 6], strides = [1, 1]} : vector<120x6xf32> to vector<24x6xf32>
    %31 = vector.extract_strided_slice %29 {offsets = [24, 0], sizes = [24, 6], strides = [1, 1]} : vector<120x6xf32> to vector<24x6xf32>
    %32 = vector.extract_strided_slice %29 {offsets = [48, 0], sizes = [24, 6], strides = [1, 1]} : vector<120x6xf32> to vector<24x6xf32>
    %33 = vector.extract_strided_slice %29 {offsets = [72, 0], sizes = [24, 6], strides = [1, 1]} : vector<120x6xf32> to vector<24x6xf32>
    %34 = vector.extract_strided_slice %29 {offsets = [96, 0], sizes = [24, 6], strides = [1, 1]} : vector<120x6xf32> to vector<24x6xf32>
    %35 = arith.mulf %30, %31 : vector<24x6xf32>
    %36 = arith.mulf %30, %30 : vector<24x6xf32>
    %37 = arith.mulf %31, %31 : vector<24x6xf32>
    %38 = arith.subf %32, %36 : vector<24x6xf32>
    %39 = arith.subf %33, %37 : vector<24x6xf32>
    %40 = arith.subf %34, %35 : vector<24x6xf32>
    %cst_15 = arith.constant 2.000000e+00 : f32
    %41 = vector.broadcast %cst_15 : f32 to vector<24x6xf32>
    %42 = arith.mulf %41, %40 : vector<24x6xf32>
    %cst_16 = arith.constant 8.99999984E-4 : f32
    %43 = vector.broadcast %cst_16 : f32 to vector<24x6xf32>
    %44 = arith.addf %42, %43 : vector<24x6xf32>
    %45 = arith.addf %38, %39 : vector<24x6xf32>
    %cst_17 = arith.constant 8.99999984E-4 : f32
    %46 = vector.broadcast %cst_17 : f32 to vector<24x6xf32>
    %47 = arith.addf %45, %46 : vector<24x6xf32>
    %48 = arith.divf %44, %47 : vector<24x6xf32>
    %cst_18 = arith.constant dense<0.000000e+00> : vector<4x6xf32>
    %49 = tpu.matmul %23, %48, %cst_18 {dimension_numbers = #tpu.dot_dimension_numbers<[1], [0], [0], [1], [0, 0, 1, 1], [], []>} : vector<4x24xf32>, vector<24x6xf32>, vector<4x6xf32> -> vector<4x6xf32>
    %cst_19 = arith.constant dense<0.000000e+00> : vector<4xf32>
    %50 = vector.multi_reduction <add>, %49, %cst_19 [1] : vector<4x6xf32> to vector<4xf32>
    %51 = vector.shape_cast %50 : vector<4xf32> to vector<4x1xf32>
    %52 = vector.shape_cast %51 : vector<4x1xf32> to vector<1x4x1xf32>
    %c0_20 = arith.constant 0 : index
    %c0_21 = arith.constant 0 : index
    %c0_22 = arith.constant 0 : index
    %53 = vector.load %arg6[%c0_20, %c0_21, %c0_22] : memref<1x4x1xf32, #tpu.memory_space<vmem>>, vector<1x4x1xf32>
    tpu.vector_store %arg6[%c0_20, %c0_21, %c0_22], %52 {strides = array<i32>} : memref<1x4x1xf32, #tpu.memory_space<vmem>>, vector<1x4x1xf32>,
    return
  }
  func.func @transform_0(%arg0: i32) -> (i32, i32, i32, i32) {
    %c0_i32 = arith.constant 0 : i32
    %c0_i32_0 = arith.constant 0 : i32
    %c0_i32_1 = arith.constant 0 : i32
    %c0_i32_2 = arith.constant 0 : i32
    return %arg0, %c0_i32, %c0_i32_0, %c0_i32_1 : i32, i32, i32, i32
  }
  func.func @transform_1(%arg0: i32) -> (i32, i32, i32) {
    %c0_i32 = arith.constant 0 : i32
    %c0_i32_0 = arith.constant 0 : i32
    %c0_i32_1 = arith.constant 0 : i32
    return %arg0, %c0_i32, %c0_i32_0 : i32, i32, i32
  }
  func.func @transform_2(%arg0: i32) -> (i32, i32) {
    %c0_i32 = arith.constant 0 : i32
    %c0_i32_0 = arith.constant 0 : i32
    %c0_i32_1 = arith.constant 0 : i32
    return %c0_i32, %c0_i32_0 : i32, i32
  }
  func.func @transform_3(%arg0: i32) -> (i32, i32) {
    %c0_i32 = arith.constant 0 : i32
    %c0_i32_0 = arith.constant 0 : i32
    %c0_i32_1 = arith.constant 0 : i32
    return %c0_i32, %c0_i32_0 : i32, i32
  }
  func.func @transform_4(%arg0: i32) -> (i32, i32) {
    %c0_i32 = arith.constant 0 : i32
    %c0_i32_0 = arith.constant 0 : i32
    %c0_i32_1 = arith.constant 0 : i32
    return %c0_i32, %c0_i32_0 : i32, i32
  }
  func.func @transform_5(%arg0: i32) -> (i32, i32, i32) {
    %c0_i32 = arith.constant 0 : i32
    %c0_i32_0 = arith.constant 0 : i32
    %c0_i32_1 = arith.constant 0 : i32
    return %arg0, %c0_i32, %c0_i32_0 : i32, i32, i32
  }
}

</mosaic_0001>

<bundles_post_ra>
// kernel: tpu_custom_call.1
= control target key start
LH: loop header
LB: loop body
LE: loop exit
PB: predicated region body
PF: predicated region fallthrough
CT: control target
= control target key end

     0   :  { %s1742_s18 = smov 0   ;;  %s2093_s0 = inlined_call_operand.vmem [shape: f32[2,4,16,16], index: 0, kind: input, shape index: {}]   ;;  %s2094_s1 = inlined_call_operand.vmem [shape: s32[2,16,16], index: 1, kind: input, shape index: {}]   ;;  %s2095_s2 = inlined_call_operand.vmem [shape: f32[120,320], index: 2, kind: input, shape index: {}]   ;;  %s2096_s3 = inlined_call_operand.vmem [shape: f32[16,6], index: 3, kind: input, shape index: {}]   ;;  %s2097_s4 = inlined_call_operand.vmem [shape: f32[4,24], index: 4, kind: input, shape index: {}]   ;;  %s2098_s5 = inlined_call_operand.vmem [shape: f32[2,4,1], index: 5, kind: output, shape index: {}]  }
   0x1 LB: > { %s1304_s19 = sadd.s32 4294967295, %s1708_s18   ;;  %p1308_p0 = scmp.ge.s32.totalorder %s1708_s18, 1  ;;  %s1708_s18 = sphi %s1742_s18, %s15_s18  }
   0x2   : > { %p197_p1 = scmp.lt.s32.totalorder %s1708_s18, 3 }
   0x4   : > { %p198_p2 = pnand %p1308_p0, %p197_p1 }
   0x5   : > { %p229_p3 = scmp.lt.s32.totalorder (!%p198_p2), %s1304_s19, 1 }
   0x6   : > { %201 = sbr.rel (%p198_p2) target bundleno = 922 (0x39a), region = 40 }
   0xb   : > { %v386_v0 = vld [vmem:[%s2096_s3 + $0x8] sm:$0xff]  ;;  %v385_v1 = vld [vmem:[%s2096_s3] sm:$0xff]  ;;  %s2100_s19 = smov (!%p229_p3, %s1304_s19), 1  ;;  %vm251_vm0 = vcmask 130048   ;;  %v1710_v2 = vmov 0.0   ;;  %vm1711_vm9 = vmmov 0  }
   0xc   : > { %1528 = vmatprep.subr.mxu0 %v386_v0  ;;  %1662 = vmatprep.subr.mxu1 %v386_v0  ;;  %s1380_s24 = sshll.u32 %s2100_s19, 6  ;;  %s1381_s28 = sshll.u32 %s2100_s19, 4  ;;  %vm797_vm10 = vcmask 523264   ;;  %vm1159_vm11 = vcmask 195584   ;;  %vm1233_vm12 = vcmask 44032   ;;  %vm1237_vm13 = vcmask 3072  }
   0xd   : > { %1529 = vmatpush3.msra.mxu0 %v386_v0  ;;  %1664 = vmatpush3.msra.mxu1 %v386_v0  ;;  %s233_s27 = scalar_lea.vmem %s2093_s0, %s1380_s24  ;;  %s238_s6 = scalar_lea.vmem %s2094_s1, %s1381_s28 }
   0xe   : > { %1530 = vmatprep.subr.mxu0 %v385_v1  ;;  %1663 = vmatprep.subr.mxu1 %v385_v1  ;;  %v243_v3 = vld [vmem:[%s233_s27] sm:$0xff]  ;;  %v245_v4 = vld [vmem:[%s233_s27 + $0x10] sm:$0xff]  ;;  %v244_v10 = vld [vmem:[%s233_s27 + $0x8] sm:$0xff]  ;;  %s1313_s7 = sshll.u32 %s2100_s19, 2 }
   0xf   : > { %1531 = vmatpush3.msra.mxu0 %v385_v1  ;;  %1665 = vmatpush3.msra.mxu1 %v385_v1  ;;  %v247_v5 = vld [vmem:[%s233_s27 + $0x20] sm:$0xff]  ;;  %v249_v6 = vld [vmem:[%s233_s27 + $0x30] sm:$0xff]  ;;  %v252_v7 = vsel %vm251_vm0, %v243_v3, -inf  ;;  %v253_v8 = vsel %vm251_vm0, %v245_v4, -inf  ;;  %v246_v11 = vld [vmem:[%s233_s27 + $0x18] sm:$0xff]  ;;  %v259_v16 = vsel %vm251_vm0, %v244_v10, -inf  ;;  %s242_s10 = scalar_lea.vmem %s2098_s5, %s1313_s7 }
  0x10   : > { %1592 = vmatprep.subr.mxu0 %v1710_v2  ;;  %v254_v9 = vsel %vm251_vm0, %v247_v5, -inf  ;;  %v256_v13 = vsel %vm251_vm0, %v249_v6, -inf  ;;  %v248_v14 = vld [vmem:[%s233_s27 + $0x28] sm:$0xff]  ;;  %v250_v15 = vld [vmem:[%s233_s27 + $0x38] sm:$0xff]  ;;  %v260_v17 = vsel %vm251_vm0, %v246_v11, -inf  ;;  %v314_v63 = vld [vmem:[%s238_s6] sm:$0xff] }
  0x11   : > { %v255_v12 = vmax.f32 %v252_v7, %v254_v9  ;;  %v257_v18 = vmax.f32 %v253_v8, %v256_v13  ;;  %v261_v19 = vsel %vm251_vm0, %v248_v14, -inf  ;;  %v263_v20 = vsel %vm251_vm0, %v250_v15, -inf  ;;  %v315_v1 = vld [vmem:[%s238_s6 + $0x8] sm:$0xff] }
  0x12   : > { %v262_v21 = vmax.f32 %v259_v16, %v261_v19  ;;  %v264_v22 = vmax.f32 %v260_v17, %v263_v20  ;;  %vm316_vm1 = vcmp.eq.s32.totalorder %v314_v63, 0  ;;  %vm317_vm2 = vcmp.eq.s32.totalorder %v315_v1, 0 }
  0x13   : > { %v258_v23 = vmax.f32 %v255_v12, %v257_v18  ;;  %vm318_vm3 = vcmp.eq.s32.totalorder %v314_v63, 1  ;;  %v1315_v12 = vsel %vm317_vm2, 1.0, %v1710_v2  ;;  %vm319_vm4 = vcmp.eq.s32.totalorder %v315_v1, 1 }
  0x14   : > { %v265_v24 = vmax.f32 %v262_v21, %v264_v22  ;;  %vm320_vm5 = vcmp.eq.s32.totalorder %v314_v63, 2  ;;  %v397_v17 = vmul.f32 %v1315_v12, %v1315_v12  ;;  %v1317_v19 = vsel %vm319_vm4, 1.0, %v1710_v2 }
  0x15   : > { %v266_v25 = vsub.f32 %v243_v3, %v258_v23  ;;  %v268_v26 = vsub.f32 %v245_v4, %v258_v23  ;;  %v270_v27 = vsub.f32 %v247_v5, %v258_v23  ;;  %v272_v28 = vsub.f32 %v249_v6, %v258_v23 }
  0x16   : > { %v267_v29 = vsub.f32 %v244_v10, %v265_v24  ;;  %v269_v30 = vsub.f32 %v246_v11, %v265_v24  ;;  %v271_v34 = vsub.f32 %v248_v14, %v265_v24  ;;  %v273_v36 = vsub.f32 %v250_v15, %v265_v24 }
  0x17   : > { %v274_v31 = vmul.f32 1.442695, %v266_v25  ;;  %v278_v32 = vmul.f32 1.442695, %v268_v26  ;;  %v282_v33 = vmul.f32 1.442695, %v270_v27  ;;  %v399_v22 = vmul.f32 %v1317_v19, %v1317_v19 }
  0x18   : > { %v286_v35 = vmul.f32 1.442695, %v272_v28  ;;  %v276_v37 = vmul.f32 1.442695, %v267_v29  ;;  %v280_v38 = vmul.f32 1.442695, %v269_v30 }
  0x19   : > { %1676 = vpow2.f32 %v274_v31  ;;  %v284_v39 = vmul.f32 1.442695, %v271_v34  ;;  %v288_v40 = vmul.f32 1.442695, %v273_v36  ;;  %v1314_v6 = vsel %vm316_vm1, 1.0, %v1710_v2 }
  0x1a   : > { %1678 = vpow2.f32 %v278_v32  ;;  %v396_v11 = vmul.f32 %v1314_v6, %v1314_v6  ;;  %v1316_v15 = vsel %vm318_vm3, 1.0, %v1710_v2  ;;  %v1318_v21 = vsel %vm320_vm5, 1.0, %v1710_v2 }
  0x1b   : > { %1680 = vpow2.f32 %v282_v33  ;;  %v398_v18 = vmul.f32 %v1316_v15, %v1316_v15  ;;  %vm321_vm6 = vcmp.eq.s32.totalorder %v315_v1, 2  ;;  %vm322_vm7 = vcmp.eq.s32.totalorder %v314_v63, 3 }
  0x1c   : > { %1682 = vpow2.f32 %v286_v35  ;;  %v400_v23 = vmul.f32 %v1318_v21, %v1318_v21  ;;  %v1319_v24 = vsel %vm321_vm6, 1.0, %v1710_v2  ;;  %v1320_v25 = vsel %vm322_vm7, 1.0, %v1710_v2 }
  0x1d   : > { %1684 = vpow2.f32 %v276_v37  ;;  %vm323_vm8 = vcmp.eq.s32.totalorder %v315_v1, 3  ;;  %v401_v26 = vmul.f32 %v1319_v24, %v1319_v24  ;;  %v402_v27 = vmul.f32 %v1320_v25, %v1320_v25 }
  0x1e   : > { %1686 = vpow2.f32 %v280_v38  ;;  %v1321_v28 = vsel %vm323_vm8, 1.0, %v1710_v2 }
  0x1f   : > { %1688 = vpow2.f32 %v284_v39  ;;  %v403_v29 = vmul.f32 %v1321_v28, %v1321_v28 }
  0x20   : > { %1690 = vpow2.f32 %v288_v40 }
  0x26   : > { %v1677_v41 = vpop.eup %1676 }
  0x27   : > { %v1679_v42 = vpop.eup %1678  ;;  %v290_v43 = vsel %vm251_vm0, %v1677_v41, 0.0 }
  0x28   : > { %v1681_v44 = vpop.eup %1680  ;;  %v291_v45 = vsel %vm251_vm0, %v1679_v42, 0.0 }
  0x29   : > { %v1683_v46 = vpop.eup %1682  ;;  %v292_v47 = vadd.f32 %v291_v45, %v290_v43  ;;  %v293_v48 = vsel %vm251_vm0, %v1681_v44, 0.0 }
  0x2a   : > { %v1685_v49 = vpop.eup %1684  ;;  %v295_v50 = vsel %vm251_vm0, %v1683_v46, 0.0 }
  0x2b   : > { %v1687_v51 = vpop.eup %1686  ;;  %v294_v52 = vadd.f32 %v293_v48, %v292_v47  ;;  %v297_v53 = vsel %vm251_vm0, %v1685_v49, 0.0 }
  0x2c   : > { %v1689_v54 = vpop.eup %1688  ;;  %v298_v55 = vsel %vm251_vm0, %v1687_v51, 0.0 }
  0x2d   : > { %v1691_v56 = vpop.eup %1690  ;;  %v296_v57 = vadd.f32 %v295_v50, %v294_v52  ;;  %v299_v58 = vadd.f32 %v298_v55, %v297_v53  ;;  %v300_v59 = vsel %vm251_vm0, %v1689_v54, 0.0 }
  0x2e   : > { %v302_v60 = vsel %vm251_vm0, %v1691_v56, 0.0 }
  0x2f   : > { %1692 = vrcp.f32 %v296_v57  ;;  %v301_v61 = vadd.f32 %v300_v59, %v299_v58 }
  0x31   : > { %v303_v62 = vadd.f32 %v302_v60, %v301_v61 }
  0x33   : > { %1694 = vrcp.f32 %v303_v62 }
  0x3c   : > { %v1693_v0 = vpop.eup %1692 }
  0x3d   : > { %v1783_v3 = vmul.f32 %v1693_v0, %v1677_v41  ;;  %v1785_v4 = vmul.f32 %v1693_v0, %v1683_v46  ;;  %v1792_v8 = vmul.f32 %v1693_v0, %v1679_v42  ;;  %v310_v16 = vmul.f32 %v1693_v0, %v1681_v44  ;;  %v341_v44 = vld [vmem:[%s2095_s2 + $0x8] sm:$0xff] }
  0x3f   : > { %1532 = vmatprep.mubr.msk.f32.mxu0 %vm251_vm0, %v1783_v3  ;;  %v394_v5 = vmul.f32 %v1785_v4, %v1785_v4  ;;  %v404_v30 = vmul.f32 %v1314_v6, %v1783_v3  ;;  %v406_v32 = vmul.f32 %v1316_v15, %v1792_v8  ;;  %v408_v34 = vmul.f32 %v1318_v21, %v310_v16 }
  0x40   : > { %v1695_v7 = vpop.eup %1694  ;;  %v388_v35 = vmul.f32 %v1783_v3, %v1783_v3  ;;  %v410_v37 = vmul.f32 %v1320_v25, %v1785_v4  ;;  %v390_v39 = vmul.f32 %v1792_v8, %v1792_v8  ;;  %v392_v42 = vmul.f32 %v310_v16, %v310_v16 }
  0x41   : > { %v1794_v9 = vmul.f32 %v1695_v7, %v1685_v49  ;;  %1565 = vmatprep.mubr.msk.f32.mxu1 %vm251_vm0, %v394_v5  ;;  %v1797_v10 = vmul.f32 %v1695_v7, %v1691_v56  ;;  %v1804_v14 = vmul.f32 %v1695_v7, %v1687_v51  ;;  %v311_v20 = vmul.f32 %v1695_v7, %v1689_v54 }
  0x43   : > { %1533 = vmatmul.mubr.msk.f32.vlgmr.msra.gmra.mxu0 %vm251_vm0, %v1794_v9  ;;  %v395_v13 = vmul.f32 %v1797_v10, %v1797_v10  ;;  %v405_v31 = vmul.f32 %v1315_v12, %v1794_v9  ;;  %v407_v33 = vmul.f32 %v1317_v19, %v1804_v14  ;;  %v409_v36 = vmul.f32 %v1319_v24, %v311_v20 }
  0x44   : > { %1535 = vmatprep.mubr.msk.f32.mxu0 %vm251_vm0, %v1792_v8  ;;  %v389_v38 = vmul.f32 %v1794_v9, %v1794_v9  ;;  %v411_v40 = vmul.f32 %v1321_v28, %v1797_v10  ;;  %v391_v41 = vmul.f32 %v1804_v14, %v1804_v14  ;;  %v393_v43 = vmul.f32 %v311_v20, %v311_v20 }
  0x45   : > { %1566 = vmatmul.mubr.msk.f32.vlgmr.msra.gmra.mxu1 %vm251_vm0, %v395_v13 }
  0x46   : > { %1568 = vmatprep.mubr.msk.f32.mxu1 %vm251_vm0, %v396_v11 }
  0x47   : > { %1536 = vmatmul.mubr.msk.f32.gmra.mxu0 %vm251_vm0, %v1804_v14 }
  0x48   : > { %1538 = vmatprep.mubr.msk.f32.mxu0 %vm251_vm0, %v310_v16 }
  0x49   : > { %1569 = vmatmul.mubr.msk.f32.gmra.mxu1 %vm251_vm0, %v397_v17 }
  0x4a   : > { %1571 = vmatprep.mubr.msk.f32.mxu1 %vm251_vm0, %v398_v18 }
  0x4b   : > { %1539 = vmatmul.mubr.msk.f32.gmra.mxu0 %vm251_vm0, %v311_v20 }
  0x4c   : > { %1541 = vmatprep.mubr.msk.f32.mxu0 %vm251_vm0, %v1785_v4 }
  0x4d   : > { %1572 = vmatmul.mubr.msk.f32.gmra.mxu1 %vm251_vm0, %v399_v22 }
  0x4e   : > { %1574 = vmatprep.mubr.msk.f32.mxu1 %vm251_vm0, %v400_v23  ;;  %v345_v23 = vld [vmem:[%s2095_s2 + $0x28] sm:$0xff] }
  0x4f   : > { %1542 = vmatmul.mubr.msk.f32.gmra.mxu0 %vm251_vm0, %v1797_v10 }
  0x50   : > { %1544 = vmatprep.mubr.msk.f32.mxu0 %vm251_vm0, %v1314_v6 }
  0x51   : > { %1575 = vmatmul.mubr.msk.f32.gmra.mxu1 %vm251_vm0, %v401_v26  ;;  %v344_v26 = vld [vmem:[%s2095_s2 + $0x20] sm:$0xff] }
  0x52   : > { %1577 = vmatprep.mubr.msk.f32.mxu1 %vm251_vm0, %v402_v27  ;;  %v351_v27 = vld [vmem:[%s2095_s2 + $0x58] sm:$0xff] }
  0x53   : > { %1545 = vmatmul.mubr.msk.f32.gmra.mxu0 %vm251_vm0, %v1315_v12 }
  0x54   : > { %1547 = vmatprep.mubr.msk.f32.mxu0 %vm251_vm0, %v1316_v15 }
  0x55   : > { %1578 = vmatmul.mubr.msk.f32.gmra.mxu1 %vm251_vm0, %v403_v29  ;;  %v347_v29 = vld [vmem:[%s2095_s2 + $0x38] sm:$0xff] }
  0x56   : > { %1580 = vmatprep.mubr.msk.f32.mxu1 %vm251_vm0, %v404_v30  ;;  %v354_v30 = vld [vmem:[%s2095_s2 + $0x70] sm:$0xff] }
  0x57   : > { %1548 = vmatmul.mubr.msk.f32.gmra.mxu0 %vm251_vm0, %v1317_v19 }
  0x58   : > { %1550 = vmatprep.mubr.msk.f32.mxu0 %vm251_vm0, %v1318_v21  ;;  %v342_v21 = vld [vmem:[%s2095_s2 + $0x10] sm:$0xff] }
  0x59   : > { %1581 = vmatmul.mubr.msk.f32.gmra.mxu1 %vm251_vm0, %v405_v31  ;;  %v346_v31 = vld [vmem:[%s2095_s2 + $0x30] sm:$0xff] }
  0x5a   : > { %1583 = vmatprep.mubr.msk.f32.mxu1 %vm251_vm0, %v406_v32  ;;  %v350_v32 = vld [vmem:[%s2095_s2 + $0x50] sm:$0xff] }
  0x5b   : > { %1551 = vmatmul.mubr.msk.f32.gmra.mxu0 %vm251_vm0, %v1319_v24  ;;  %v348_v24 = vld [vmem:[%s2095_s2 + $0x40] sm:$0xff] }
  0x5c   : > { %1553 = vmatprep.mubr.msk.f32.mxu0 %vm251_vm0, %v1320_v25  ;;  %v340_v25 = vld [vmem:[%s2095_s2] sm:$0xff] }
  0x5d   : > { %1584 = vmatmul.mubr.msk.f32.gmra.mxu1 %vm251_vm0, %v407_v33  ;;  %v357_v33 = vld [vmem:[%s2095_s2 + $0x88] sm:$0xff] }
  0x5e   : > { %1586 = vmatprep.mubr.msk.f32.mxu1 %vm251_vm0, %v408_v34  ;;  %v349_v34 = vld [vmem:[%s2095_s2 + $0x48] sm:$0xff] }
  0x5f   : > { %1554 = vmatmul.mubr.msk.f32.gmra.mxu0 %vm251_vm0, %v1321_v28  ;;  %v343_v28 = vld [vmem:[%s2095_s2 + $0x18] sm:$0xff] }
  0x60   : > { %1556 = vmatprep.mubr.msk.f32.mxu0 %vm251_vm0, %v388_v35  ;;  %v353_v35 = vld [vmem:[%s2095_s2 + $0x68] sm:$0xff] }
  0x61   : > { %1587 = vmatmul.mubr.msk.f32.gmra.mxu1 %vm251_vm0, %v409_v36  ;;  %v360_v36 = vld [vmem:[%s2095_s2 + $0xa0] sm:$0xff] }
  0x62   : > { %1589 = vmatprep.mubr.msk.f32.mxu1 %vm251_vm0, %v410_v37  ;;  %v352_v37 = vld [vmem:[%s2095_s2 + $0x60] sm:$0xff] }
  0x63   : > { %1557 = vmatmul.mubr.msk.f32.gmra.mxu0 %vm251_vm0, %v389_v38  ;;  %v356_v38 = vld [vmem:[%s2095_s2 + $0x80] sm:$0xff] }
  0x64   : > { %1559 = vmatprep.mubr.msk.f32.mxu0 %vm251_vm0, %v390_v39  ;;  %v363_v39 = vld [vmem:[%s2095_s2 + $0xb8] sm:$0xff] }
  0x65   : > { %1590 = vmatmul.mubr.msk.f32.gmra.mxu1 %vm251_vm0, %v411_v40  ;;  %v355_v40 = vld [vmem:[%s2095_s2 + $0x78] sm:$0xff] }
  0x66   : > { %907 = vmatprep.mubr.f32.mxu1 %v341_v44  ;;  %v362_v44 = vld [vmem:[%s2095_s2 + $0xb0] sm:$0xff] }
  0x67   : > { %1560 = vmatmul.mubr.msk.f32.gmra.mxu0 %vm251_vm0, %v391_v41  ;;  %v359_v41 = vld [vmem:[%s2095_s2 + $0x98] sm:$0xff] }
  0x68   : > { %1562 = vmatprep.mubr.msk.f32.mxu0 %vm251_vm0, %v392_v42  ;;  %v366_v42 = vld [vmem:[%s2095_s2 + $0xd0] sm:$0xff] }
  0x6b   : > { %1563 = vmatmul.mubr.msk.f32.gmra.mxu0 %vm251_vm0, %v393_v43  ;;  %v358_v43 = vld [vmem:[%s2095_s2 + $0x90] sm:$0xff] }
  0x6c   : > { %1608 = vmatprep.mubr.msk.f32.mxu0 %vm1711_vm9, %v1710_v2 }
 0x103   : > { %v1872_v45 = vpop.f32.mrf.mxu0 }
 0x105   : > { %v1874_v46 = vpop.f32.mrf.mxu0  ;;  %v1567_v47 = vpop.f32.mrf.mxu1 }
 0x107   : > { %v1876_v48 = vpop.f32.mrf.mxu0  ;;  %v1878_v49 = vpop.f32.mrf.mxu1 }
 0x109   : > { %v1880_v50 = vpop.f32.mrf.mxu0  ;;  %v1570_v51 = vpop.f32.mrf.mxu1 }
 0x10b   : > { %v1882_v52 = vpop.f32.mrf.mxu0  ;;  %v718_v53 = vpop.f32.mrf.mxu1 }
 0x10d   : > { %v1884_v54 = vpop.f32.mrf.mxu0  ;;  %v1573_v55 = vpop.f32.mrf.mxu1 }
 0x10f   : > { %v1543_v56 = vpop.f32.mrf.mxu0  ;;  %v728_v57 = vpop.f32.mrf.mxu1 }
 0x111   : > { %v628_v58 = vpop.f32.mrf.mxu0  ;;  %v1576_v59 = vpop.f32.mrf.mxu1 }
 0x113   : > { %v1546_v60 = vpop.f32.mrf.mxu0  ;;  %v738_v61 = vpop.f32.mrf.mxu1 }
 0x115   : > { %v638_v62 = vpop.f32.mrf.mxu0  ;;  %v1579_v63 = vpop.f32.mrf.mxu1 }
 0x116   : > { %1424 = vmatprep.subr.mxu1 %v1579_v63  ;;  %v379_v63 = vld [vmem:[%s2095_s2 + $0x138] sm:$0xff] }
 0x117   : > { %v1549_v0 = vpop.f32.mrf.mxu0  ;;  %v748_v1 = vpop.f32.mrf.mxu1 }
 0x119   : > { %v648_v3 = vpop.f32.mrf.mxu0  ;;  %v1582_v4 = vpop.f32.mrf.mxu1 }
 0x11b   : > { %v1552_v5 = vpop.f32.mrf.mxu0  ;;  %v758_v6 = vpop.f32.mrf.mxu1 }
 0x11d   : > { %v658_v7 = vpop.f32.mrf.mxu0  ;;  %v1585_v8 = vpop.f32.mrf.mxu1 }
 0x11f   : > { %v1555_v9 = vpop.f32.mrf.mxu0  ;;  %v768_v10 = vpop.f32.mrf.mxu1 }
 0x120   : > { %1425 = vmatpush3.msra.mxu1 %v1555_v9 }
 0x121   : > { %v668_v11 = vpop.f32.mrf.mxu0  ;;  %v1588_v12 = vpop.f32.mrf.mxu1  ;;  %1426 = vmatprep.subr.mxu1 %v748_v1  ;;  %v382_v1 = vld [vmem:[%s2095_s2 + $0x150] sm:$0xff] }
 0x122   : > { %1427 = vmatpush3.msra.mxu1 %v668_v11 }
 0x123   : > { %v778_v13 = vpop.f32.mrf.mxu1  ;;  %1428 = vmatprep.subr.mxu1 %v1576_v59  ;;  %v1558_v14 = vpop.f32.mrf.mxu0  ;;  %v377_v59 = vld [vmem:[%s2095_s2 + $0x128] sm:$0xff] }
 0x124   : > { %1429 = vmatpush3.msra.mxu1 %v1552_v5 }
 0x125   : > { %v1591_v15 = vpop.f32.mrf.mxu1  ;;  %1430 = vmatprep.subr.mxu1 %v738_v61  ;;  %v678_v16 = vpop.f32.mrf.mxu0  ;;  %v376_v61 = vld [vmem:[%s2095_s2 + $0x120] sm:$0xff] }
 0x126   : > { %1431 = vmatpush3.msra.mxu1 %v658_v7  ;;  %1593 = vmatpush3.msra.mxu0 %v1591_v15 }
 0x127   : > { %v788_v17 = vpop.f32.mrf.mxu1  ;;  %1432 = vmatprep.subr.mxu1 %v1573_v55  ;;  %1594 = vmatprep.subr.mxu0 %v1710_v2  ;;  %v1561_v18 = vpop.f32.mrf.mxu0  ;;  %v370_v55 = vld [vmem:[%s2095_s2 + $0xf0] sm:$0xff] }
 0x128   : > { %1433 = vmatpush3.msra.mxu1 %v1549_v0  ;;  %1595 = vmatpush3.msra.mxu0 %v788_v17  ;;  %v383_v0 = vld [vmem:[%s2095_s2 + $0x158] sm:$0xff] }
 0x129   : > { %1434 = vmatprep.subr.mxu1 %v728_v57  ;;  %1596 = vmatprep.subr.mxu0 %v1710_v2  ;;  %v688_v19 = vpop.f32.mrf.mxu0  ;;  %v381_v57 = vld [vmem:[%s2095_s2 + $0x148] sm:$0xff] }
 0x12a   : > { %1435 = vmatpush3.msra.mxu1 %v648_v3  ;;  %1597 = vmatpush3.msra.mxu0 %v1588_v12 }
 0x12b   : > { %1436 = vmatprep.subr.mxu1 %v1570_v51  ;;  %1598 = vmatprep.subr.mxu0 %v1710_v2  ;;  %v1564_v20 = vpop.f32.mrf.mxu0  ;;  %v375_v51 = vld [vmem:[%s2095_s2 + $0x118] sm:$0xff] }
 0x12c   : > { %1437 = vmatpush3.msra.mxu1 %v1546_v60  ;;  %1599 = vmatpush3.msra.mxu0 %v778_v13  ;;  %v384_v60 = vld [vmem:[%s2095_s2 + $0x160] sm:$0xff] }
 0x12d   : > { %1438 = vmatprep.subr.mxu1 %v718_v53  ;;  %1600 = vmatprep.subr.mxu0 %v1710_v2  ;;  %v698_v22 = vpop.f32.mrf.mxu0  ;;  %v371_v53 = vld [vmem:[%s2095_s2 + $0xf8] sm:$0xff] }
 0x12e   : > { %1439 = vmatpush3.msra.mxu1 %v638_v62  ;;  %1601 = vmatpush3.msra.mxu0 %v1585_v8  ;;  %v380_v62 = vld [vmem:[%s2095_s2 + $0x140] sm:$0xff] }
 0x12f   : > { %1440 = vmatprep.subr.mxu1 %v1567_v47  ;;  %1602 = vmatprep.subr.mxu0 %v1710_v2  ;;  %v365_v47 = vld [vmem:[%s2095_s2 + $0xc8] sm:$0xff] }
 0x130   : > { %1441 = vmatpush3.msra.mxu1 %v1543_v56  ;;  %1603 = vmatpush3.msra.mxu0 %v768_v10  ;;  %v374_v56 = vld [vmem:[%s2095_s2 + $0x110] sm:$0xff] }
 0x131   : > { %1442 = vmatprep.subr.mxu1 %v1878_v49  ;;  %1604 = vmatprep.subr.mxu0 %v1710_v2  ;;  %v364_v49 = vld [vmem:[%s2095_s2 + $0xc0] sm:$0xff] }
 0x132   : > { %1443 = vmatpush3.msra.mxu1 %v628_v58  ;;  %1605 = vmatpush3.msra.mxu0 %v1582_v4  ;;  %v373_v58 = vld [vmem:[%s2095_s2 + $0x108] sm:$0xff] }
 0x133   : > { %1444 = vmatprep.subr.mxu1 %v1564_v20  ;;  %1606 = vmatprep.subr.mxu0 %v1710_v2 }
 0x134   : > { %1445 = vmatpush3.msra.mxu1 %v1882_v52  ;;  %1607 = vmatpush3.msra.mxu0 %v758_v6  ;;  %v367_v52 = vld [vmem:[%s2095_s2 + $0xd8] sm:$0xff] }
 0x135   : > { %1446 = vmatprep.subr.mxu1 %v698_v22  ;;  %1609 = vmatmul.mubr.msk.f32.vlgmr.msra.gmra.mxu0 %vm797_vm10, %v342_v21 }
 0x136   : > { %1447 = vmatpush3.msra.mxu1 %v1884_v54  ;;  %1611 = vmatprep.mubr.msk.f32.mxu0 %vm1711_vm9, %v1710_v2  ;;  %v378_v54 = vld [vmem:[%s2095_s2 + $0x130] sm:$0xff] }
 0x137   : > { %1448 = vmatprep.subr.mxu1 %v1561_v18 }
 0x138   : > { %1449 = vmatpush3.msra.mxu1 %v1876_v48  ;;  %v372_v48 = vld [vmem:[%s2095_s2 + $0x100] sm:$0xff] }
 0x139   : > { %1450 = vmatprep.subr.mxu1 %v688_v19  ;;  %1612 = vmatmul.mubr.msk.f32.gmra.mxu0 %vm797_vm10, %v345_v23 }
 0x13a   : > { %1451 = vmatpush3.msra.mxu1 %v1880_v50  ;;  %1614 = vmatprep.mubr.msk.f32.mxu0 %vm1711_vm9, %v1710_v2  ;;  %v368_v50 = vld [vmem:[%s2095_s2 + $0xe0] sm:$0xff] }
 0x13b   : > { %1452 = vmatprep.subr.mxu1 %v1558_v14 }
 0x13c   : > { %1453 = vmatpush3.msra.mxu1 %v1872_v45  ;;  %v369_v45 = vld [vmem:[%s2095_s2 + $0xe8] sm:$0xff] }
 0x13d   : > { %1454 = vmatprep.subr.mxu1 %v678_v16  ;;  %1615 = vmatmul.mubr.msk.f32.gmra.mxu0 %vm797_vm10, %v348_v24 }
 0x13e   : > { %1455 = vmatpush3.msra.mxu1 %v1874_v46  ;;  %1617 = vmatprep.mubr.msk.f32.mxu0 %vm1711_vm9, %v1710_v2  ;;  %v361_v46 = vld [vmem:[%s2095_s2 + $0xa8] sm:$0xff] }
 0x13f   : > { %908 = vmatmul.mubr.f32.vlgmr.msra.gmra.mxu1 %v340_v25  ;;  %1653 = vmatprep.subr.mxu1 %v1710_v2 }
 0x140   : > { %912 = vmatprep.mubr.f32.mxu1 %v344_v26 }
 0x141   : > { %1618 = vmatmul.mubr.msk.f32.gmra.mxu0 %vm797_vm10, %v351_v27 }
 0x142   : > { %1620 = vmatprep.mubr.msk.f32.mxu0 %vm1711_vm9, %v1710_v2 }
 0x143   : > { %913 = vmatmul.mubr.f32.gmra.mxu1 %v343_v28 }
 0x144   : > { %917 = vmatprep.mubr.f32.mxu1 %v347_v29 }
 0x145   : > { %1621 = vmatmul.mubr.msk.f32.gmra.mxu0 %vm797_vm10, %v354_v30 }
 0x146   : > { %1623 = vmatprep.mubr.msk.f32.mxu0 %vm1711_vm9, %v1710_v2 }
 0x147   : > { %918 = vmatmul.mubr.f32.gmra.mxu1 %v346_v31 }
 0x148   : > { %922 = vmatprep.mubr.f32.mxu1 %v350_v32 }
 0x149   : > { %1624 = vmatmul.mubr.msk.f32.gmra.mxu0 %vm797_vm10, %v357_v33 }
 0x14a   : > { %1626 = vmatprep.mubr.msk.f32.mxu0 %vm1711_vm9, %v1710_v2 }
 0x14b   : > { %923 = vmatmul.mubr.f32.gmra.mxu1 %v349_v34 }
 0x14c   : > { %927 = vmatprep.mubr.f32.mxu1 %v353_v35 }
 0x14d   : > { %1627 = vmatmul.mubr.msk.f32.gmra.mxu0 %vm797_vm10, %v360_v36 }
 0x14e   : > { %1629 = vmatprep.mubr.msk.f32.mxu0 %vm1711_vm9, %v1710_v2 }
 0x14f   : > { %928 = vmatmul.mubr.f32.gmra.mxu1 %v352_v37 }
 0x150   : > { %932 = vmatprep.mubr.f32.mxu1 %v356_v38 }
 0x151   : > { %1630 = vmatmul.mubr.msk.f32.gmra.mxu0 %vm797_vm10, %v363_v39 }
 0x152   : > { %1632 = vmatprep.mubr.msk.f32.mxu0 %vm1711_vm9, %v1710_v2 }
 0x153   : > { %933 = vmatmul.mubr.f32.gmra.mxu1 %v355_v40 }
 0x154   : > { %937 = vmatprep.mubr.f32.mxu1 %v359_v41 }
 0x155   : > { %1633 = vmatmul.mubr.msk.f32.gmra.mxu0 %vm797_vm10, %v366_v42 }
 0x156   : > { %1635 = vmatprep.mubr.msk.f32.mxu0 %vm1711_vm9, %v1710_v2 }
 0x157   : > { %938 = vmatmul.mubr.f32.gmra.mxu1 %v358_v43 }
 0x158   : > { %942 = vmatprep.mubr.f32.mxu1 %v362_v44 }
 0x159   : > { %1636 = vmatmul.mubr.msk.f32.gmra.mxu0 %vm797_vm10, %v369_v45 }
 0x15a   : > { %1638 = vmatprep.mubr.msk.f32.mxu0 %vm1711_vm9, %v1710_v2 }
 0x15b   : > { %943 = vmatmul.mubr.f32.gmra.mxu1 %v361_v46 }
 0x15c   : > { %947 = vmatprep.mubr.f32.mxu1 %v365_v47 }
 0x15d   : > { %1639 = vmatmul.mubr.msk.f32.gmra.mxu0 %vm797_vm10, %v372_v48 }
 0x15e   : > { %1641 = vmatprep.mubr.msk.f32.mxu0 %vm1711_vm9, %v1710_v2 }
 0x15f   : > { %948 = vmatmul.mubr.f32.gmra.mxu1 %v364_v49 }
 0x160   : > { %952 = vmatprep.mubr.f32.mxu1 %v368_v50 }
 0x161   : > { %1642 = vmatmul.mubr.msk.f32.gmra.mxu0 %vm797_vm10, %v375_v51 }
 0x162   : > { %1644 = vmatprep.mubr.msk.f32.mxu0 %vm1711_vm9, %v1710_v2 }
 0x163   : > { %953 = vmatmul.mubr.f32.gmra.mxu1 %v367_v52 }
 0x164   : > { %957 = vmatprep.mubr.f32.mxu1 %v371_v53 }
 0x165   : > { %1645 = vmatmul.mubr.msk.f32.gmra.mxu0 %vm797_vm10, %v378_v54 }
 0x166   : > { %1647 = vmatprep.mubr.msk.f32.mxu0 %vm1711_vm9, %v1710_v2 }
 0x167   : > { %958 = vmatmul.mubr.f32.gmra.mxu1 %v370_v55 }
 0x168   : > { %962 = vmatprep.mubr.f32.mxu1 %v374_v56 }
 0x169   : > { %1648 = vmatmul.mubr.msk.f32.gmra.mxu0 %vm797_vm10, %v381_v57 }
 0x16a   : > { %1650 = vmatprep.mubr.msk.f32.mxu0 %vm1711_vm9, %v1710_v2 }
 0x16b   : > { %963 = vmatmul.mubr.f32.gmra.mxu1 %v373_v58 }
 0x16c   : > { %967 = vmatprep.mubr.f32.mxu1 %v377_v59 }
 0x16d   : > { %1651 = vmatmul.mubr.msk.f32.gmra.mxu0 %vm797_vm10, %v384_v60 }
 0x16f   : > { %968 = vmatmul.mubr.f32.gmra.mxu1 %v376_v61 }
 0x170   : > { %972 = vmatprep.mubr.f32.mxu1 %v380_v62 }
 0x173   : > { %973 = vmatmul.mubr.f32.gmra.mxu1 %v379_v63 }
 0x174   : > { %977 = vmatprep.mubr.f32.mxu1 %v383_v0 }
 0x177   : > { %978 = vmatmul.mubr.f32.gmra.mxu1 %v382_v1 }
 0x178   : > { %1659 = vmatprep.mubr.msk.f32.mxu1 %vm1711_vm9, %v1710_v2 }
 0x1f5   : > { %v1049_v3 = vpop.f32.mrf.mxu0 }
 0x1f7   : > { %v1610_v4 = vpop.f32.mrf.mxu0 }
 0x1f9   : > { %v1054_v5 = vpop.f32.mrf.mxu0 }
 0x1fb   : > { %v1613_v6 = vpop.f32.mrf.mxu0 }
 0x1fd   : > { %v2078_v7 = vpop.f32.mrf.mxu0 }
 0x1ff   : > { %v1456_v8 = vpop.f32.mrf.mxu1  ;;  %v1616_v9 = vpop.f32.mrf.mxu0 }
 0x201   : > { %v1457_v10 = vpop.f32.mrf.mxu1  ;;  %v1064_v11 = vpop.f32.mrf.mxu0 }
 0x202   : > { %v1458_v49 = vadd.f32 %v1457_v10, %v1456_v8 }
 0x203   : > { %v1459_v12 = vpop.f32.mrf.mxu1  ;;  %v1619_v13 = vpop.f32.mrf.mxu0 }
 0x204   : > { %v1050_v62 = vadd.f32 %v1458_v49, %v1049_v3 }
 0x205   : > { %v1460_v14 = vpop.f32.mrf.mxu1  ;;  %v1069_v15 = vpop.f32.mrf.mxu0 }
 0x206   : > { %v1461_v44 = vadd.f32 %v1460_v14, %v1459_v12 }
 0x207   : > { %v1462_v16 = vpop.f32.mrf.mxu1  ;;  %v1622_v17 = vpop.f32.mrf.mxu0 }
 0x208   : > { %v1055_v54 = vadd.f32 %v1461_v44, %v1054_v5 }
 0x209   : > { %v1463_v18 = vpop.f32.mrf.mxu1  ;;  %v1074_v19 = vpop.f32.mrf.mxu0 }
 0x20a   : > { %v1464_v55 = vadd.f32 %v1463_v18, %v1462_v16  ;;  %v1127_v8 = vmul.f32 %v1055_v54, %v1055_v54 }
 0x20b   : > { %v1465_v20 = vpop.f32.mrf.mxu1  ;;  %v1625_v21 = vpop.f32.mrf.mxu0 }
 0x20c   : > { %v1060_v10 = vadd.f32 %v1464_v55, %v2078_v7 }
 0x20d   : > { %v1466_v22 = vpop.f32.mrf.mxu1  ;;  %v1079_v23 = vpop.f32.mrf.mxu0 }
 0x20e   : > { %v1467_v45 = vadd.f32 %v1466_v22, %v1465_v20 }
 0x20f   : > { %v1468_v24 = vpop.f32.mrf.mxu1  ;;  %v1628_v25 = vpop.f32.mrf.mxu0 }
 0x210   : > { %v1065_v56 = vadd.f32 %v1467_v45, %v1064_v11 }
 0x211   : > { %v1469_v26 = vpop.f32.mrf.mxu1  ;;  %v1084_v27 = vpop.f32.mrf.mxu0 }
 0x212   : > { %v1470_v48 = vadd.f32 %v1469_v26, %v1468_v24  ;;  %v1129_v12 = vmul.f32 %v1065_v56, %v1065_v56  ;;  %v1128_v26 = vmul.f32 %v1060_v10, %v1060_v10 }
 0x213   : > { %v1471_v28 = vpop.f32.mrf.mxu1  ;;  %v1631_v29 = vpop.f32.mrf.mxu0 }
 0x214   : > { %v1070_v59 = vadd.f32 %v1470_v48, %v1069_v15  ;;  %v1126_v15 = vmul.f32 %v1050_v62, %v1050_v62 }
 0x215   : > { %v1472_v30 = vpop.f32.mrf.mxu1  ;;  %v1089_v31 = vpop.f32.mrf.mxu0 }
 0x216   : > { %v1473_v60 = vadd.f32 %v1472_v30, %v1471_v28  ;;  %v1130_v14 = vmul.f32 %v1070_v59, %v1070_v59 }
 0x217   : > { %v1474_v32 = vpop.f32.mrf.mxu1  ;;  %v1634_v33 = vpop.f32.mrf.mxu0 }
 0x218   : > { %v1075_v11 = vadd.f32 %v1473_v60, %v1074_v19 }
 0x219   : > { %v1475_v34 = vpop.f32.mrf.mxu1  ;;  %v1094_v35 = vpop.f32.mrf.mxu0 }
 0x21a   : > { %v1476_v61 = vadd.f32 %v1475_v34, %v1474_v32  ;;  %v1131_v29 = vmul.f32 %v1075_v11, %v1075_v11 }
 0x21b   : > { %v1477_v36 = vpop.f32.mrf.mxu1  ;;  %v1637_v37 = vpop.f32.mrf.mxu0 }
 0x21c   : > { %v1080_v16 = vadd.f32 %v1476_v61, %v1079_v23 }
 0x21d   : > { %v1478_v38 = vpop.f32.mrf.mxu1  ;;  %v1099_v39 = vpop.f32.mrf.mxu0 }
 0x21e   : > { %v1479_v50 = vadd.f32 %v1478_v38, %v1477_v36  ;;  %v1132_v7 = vsub.f32 %v1080_v16, %v1126_v15 }
 0x21f   : > { %v1480_v40 = vpop.f32.mrf.mxu1  ;;  %v1640_v41 = vpop.f32.mrf.mxu0 }
 0x220   : > { %v1085_v63 = vadd.f32 %v1479_v50, %v1084_v27  ;;  %v1123_v50 = vmul.f32 %v1065_v56, %v1050_v62 }
 0x221   : > { %v1481_v42 = vpop.f32.mrf.mxu1  ;;  %v1104_v43 = vpop.f32.mrf.mxu0 }
 0x222   : > { %v1482_v4 = vadd.f32 %v1481_v42, %v1480_v40  ;;  %v1133_v18 = vsub.f32 %v1085_v63, %v1127_v8 }
 0x223   : > { %v1483_v46 = vpop.f32.mrf.mxu1  ;;  %v1643_v47 = vpop.f32.mrf.mxu0 }
 0x224   : > { %v1090_v21 = vadd.f32 %v1482_v4, %v1089_v31  ;;  %v1125_v47 = vmul.f32 %v1075_v11, %v1060_v10 }
 0x225   : > { %v1484_v51 = vpop.f32.mrf.mxu1  ;;  %v1109_v52 = vpop.f32.mrf.mxu0 }
 0x226   : > { %v1485_v53 = vadd.f32 %v1484_v51, %v1483_v46  ;;  %v1134_v34 = vsub.f32 %v1090_v21, %v1128_v26 }
 0x227   : > { %v1486_v57 = vpop.f32.mrf.mxu1  ;;  %v1646_v58 = vpop.f32.mrf.mxu0 }
 0x228   : > { %v1095_v6 = vadd.f32 %v1485_v53, %v1094_v35 }
 0x229   : > { %v1487_v0 = vpop.f32.mrf.mxu1  ;;  %v1114_v1 = vpop.f32.mrf.mxu0 }
 0x22a   : > { %v1488_v9 = vadd.f32 %v1487_v0, %v1486_v57  ;;  %v1135_v22 = vsub.f32 %v1095_v6, %v1129_v12 }
 0x22b   : > { %v1489_v13 = vpop.f32.mrf.mxu1  ;;  %v1649_v5 = vpop.f32.mrf.mxu0 }
 0x22c   : > { %v1100_v17 = vadd.f32 %v1488_v9, %v1099_v39  ;;  %v1147_v19 = vadd.f32 %v1135_v22, %v1132_v7 }
 0x22d   : > { %v1490_v20 = vpop.f32.mrf.mxu1  ;;  %v1119_v3 = vpop.f32.mrf.mxu0 }
 0x22e   : > { %v1136_v24 = vsub.f32 %v1100_v17, %v1130_v14  ;;  %v1491_v25 = vadd.f32 %v1490_v20, %v1489_v13  ;;  %v1150_v39 = vadd.f32 0.0009, %v1147_v19 }
 0x22f   : > { %v1492_v27 = vpop.f32.mrf.mxu1  ;;  %v1652_v28 = vpop.f32.mrf.mxu0 }
 0x230   : > { %v1148_v30 = vadd.f32 %v1136_v24, %v1133_v18  ;;  %v1105_v32 = vadd.f32 %v1491_v25, %v1104_v43  ;;  %v1124_v43 = vmul.f32 %v1070_v59, %v1055_v54  ;;  %v387_v54 = vld [vmem:[%s2097_s4] sm:$0xf] }
 0x231   : > { %v1493_v33 = vpop.f32.mrf.mxu1 }
 0x232   : > { %v1137_v23 = vsub.f32 %v1105_v32, %v1131_v29  ;;  %v1151_v35 = vadd.f32 0.0009, %v1148_v30  ;;  %v1494_v42 = vadd.f32 %v1493_v33, %v1492_v27 }
 0x233   : > { %v1495_v36 = vpop.f32.mrf.mxu1 }
 0x234   : > { %v1149_v37 = vadd.f32 %v1137_v23, %v1134_v34  ;;  %1696 = vrcp.f32 %v1151_v35  ;;  %v1110_v48 = vadd.f32 %v1494_v42, %v1109_v52 }
 0x235   : > { %v1496_v38 = vpop.f32.mrf.mxu1 }
 0x236   : > { %v1152_v31 = vadd.f32 0.0009, %v1149_v37  ;;  %v1497_v40 = vadd.f32 %v1496_v38, %v1495_v36  ;;  %v1138_v55 = vsub.f32 %v1110_v48, %v1123_v50 }
 0x237   : > { %v1498_v41 = vpop.f32.mrf.mxu1 }
 0x238   : > { %1698 = vrcp.f32 %v1152_v31  ;;  %v1115_v45 = vadd.f32 %v1497_v40, %v1114_v1  ;;  %v1141_v61 = vmul.f32 2.0, %v1138_v55 }
 0x239   : > { %v1499_v44 = vpop.f32.mrf.mxu1  ;;  %1700 = vrcp.f32 %v1150_v39 }
 0x23a   : > { %v1500_v46 = vadd.f32 %v1499_v44, %v1498_v41  ;;  %v1139_v51 = vsub.f32 %v1115_v45, %v1124_v43  ;;  %v1144_v8 = vadd.f32 0.0009, %v1141_v61 }
 0x23c   : > { %v1120_v49 = vadd.f32 %v1500_v46, %v1119_v3  ;;  %v1142_v58 = vmul.f32 2.0, %v1139_v51 }
 0x23e   : > { %v1140_v53 = vsub.f32 %v1120_v49, %v1125_v47  ;;  %v1145_v4 = vadd.f32 0.0009, %v1142_v58 }
 0x240   : > { %v1143_v57 = vmul.f32 2.0, %v1140_v53 }
 0x241   : > { %v1697_v60 = vpop.eup %1696 }
 0x242   : > { %v1146_v63 = vadd.f32 0.0009, %v1143_v57  ;;  %v1156_v1 = vmul.f32 %v1697_v60, %v1145_v4 }
 0x245   : > { %v1699_v0 = vpop.eup %1698 }
 0x246   : > { %v1158_v6 = vmul.f32 %v1699_v0, %v1146_v63  ;;  %v1701_v9 = vpop.eup %1700 }
 0x247   : > { %v1154_v52 = vmul.f32 %v1701_v9, %v1144_v8 }
 0x248   : > { %1654 = vmatpush3.msra.mxu1 %v1158_v6 }
 0x249   : > { %1655 = vmatprep.subr.mxu1 %v1710_v2 }
 0x24a   : > { %1656 = vmatpush3.msra.mxu1 %v1156_v1 }
 0x24b   : > { %1657 = vmatprep.subr.mxu1 %v1710_v2 }
 0x24c   : > { %1658 = vmatpush3.msra.mxu1 %v1154_v52 }
 0x24d   : > { %1660 = vmatmul.mubr.msk.f32.vlgmr.msra.gmra.mxu1 %vm1159_vm11, %v387_v54 }
 0x30d   : > { %v1229_v56 = vpop.f32.mrf.mxu1 }
 0x30e   : > { %v1234_v59 = vsel %vm1233_vm12, %v1229_v56, 0.0 }
 0x30f   : > { %v1661_v62 = vpop.f32.mrf.mxu1  ;;  %1235 = vadd.xlane.f32.xlu0 %v1234_v59 }
 0x398   : > { %v1236_v10 = vpop.xlane.xlu0 %1235 }
 0x399   : > { %1238 = vst.msk [vmem:[%s242_s10] sm:$0xf] %vm1237_vm13, %v1236_v10 }
 0x39a PF: > { %s15_s18 = sadd.s32 1, %s1708_s18  }
 0x39b   : > { %p12_p4 = scmp.ge.s32.totalorder %s15_s18, 4  }
 0x39d   :  { %14 = sbr.rel (!%p12_p4) target bundleno = 1 (0x1), region = 73 }

</bundles_post_ra>
